<compile_context>
chip_gen: v5e
topology: v5e:2x2
jax: 0.10.0
libtpu: 0.0.40
codegen_flags: <defaults>
</compile_context>

<pallas_src>
import functools

import jax
import jax.numpy as jnp
from jax import lax
from jax.experimental import pallas as pl
from jax.experimental.pallas import tpu as pltpu


def _tv_loss_kernel(x_ref, mh_ref, mw_ref, oh_ref, ow_ref,
                    sum_h_ref, sum_w_ref, *,
                    hw, w, blk, bpc, nc, needs_row_mask):
    i = pl.program_id(1)          # block axis (reduction, "arbitrary")

    @pl.when(i == 0)
    def _init():
        sum_h_ref[...] = jnp.zeros_like(sum_h_ref)
        sum_w_ref[...] = jnp.zeros_like(sum_w_ref)

    x = x_ref[...].astype(jnp.float32)                     # (blk, H*W)

    if needs_row_mask:  # static Python flag: only traced for ragged shapes
        c = pl.program_id(0)
        row_start = (c * bpc + i) * blk
        rows = lax.broadcasted_iota(jnp.int32, (blk, 1), 0)
        x = jnp.where(rows < (nc - row_start), x, 0.0)     # zero invalid rows

    mh = mh_ref[...] != 0.0                                # (1, H*W) resident
    mw = mw_ref[...] != 0.0                                # wrap-around masks

    # Height (vertical) neighbour: one image-row below == W lanes ahead.
    # roll(x, hw - w) => out[:, i] = x[:, (i + w) % hw]; select kills wrap row.
    xh = pltpu.roll(x, shift=hw - w, axis=1)
    dh = jnp.where(mh, xh - x, 0.0)
    sum_h_ref[...] += jnp.sum(dh * dh)

    # Width (horizontal) neighbour: one lane ahead; mask last column per row.
    xw = pltpu.roll(x, shift=hw - 1, axis=1)
    dw = jnp.where(mw, xw - x, 0.0)
    sum_w_ref[...] += jnp.sum(dw * dw)

    @pl.when(i == bpc - 1)
    def _finalize():
        oh_ref[...] = jnp.broadcast_to(sum_h_ref[...], oh_ref.shape)
        ow_ref[...] = jnp.broadcast_to(sum_w_ref[...], ow_ref.shape)


def tv_loss(x, *, block_nc=None, target_block_bytes=4 * 1024 * 1024):
    """Pallas TPU implementation of TVLoss.forward for an NCHW input."""
    n, c, h, w = x.shape
    hw = h * w
    nc = n * c
    count_h = c * (h - 1) * w
    count_w = c * h * (w - 1)

    # Lane-dense layout: collapse (H, W) onto the lane axis.
    x2 = x.reshape(nc, hw)
    itemsize = x2.dtype.itemsize

    # Wrap-around masks over the flattened plane, built once in the wrapper.
    pos = jnp.arange(hw, dtype=jnp.int32)
    mask_h = (pos < (h - 1) * w).astype(jnp.float32).reshape(1, hw)
    mask_w = (pos % w != (w - 1)).astype(jnp.float32).reshape(1, hw)

    # Sublane block over N*C: multiple of 8, ~target bytes; full dim if small.
    if block_nc is None:
        blk = (target_block_bytes // max(1, hw * itemsize) // 8) * 8
    else:
        blk = ((block_nc + 7) // 8) * 8
    blk = max(8, blk)
    if blk >= nc:
        blk = nc                         # single full-extent block (any nc)
    total_blocks = -(-nc // blk)

    # Split the block axis across TensorCores (v7x megacore); harmless on 1 TC.
    num_cores = 2 if total_blocks >= 2 else 1
    bpc = -(-total_blocks // num_cores)                 # blocks per core
    needs_row_mask = (num_cores * bpc * blk != nc)      # ragged / overshoot

    if num_cores * bpc > total_blocks:
        # Overshoot blocks on the last core: clamp the DMA index (their rows
        # are fully zero-masked in-kernel, so they contribute nothing).
        x_map = lambda c_, i: (jnp.minimum(c_ * bpc + i, total_blocks - 1), 0)
    else:
        x_map = lambda c_, i: (c_ * bpc + i, 0)

    kernel = functools.partial(
        _tv_loss_kernel, hw=hw, w=w, blk=blk, bpc=bpc, nc=nc,
        needs_row_mask=needs_row_mask)

    out_row = jax.ShapeDtypeStruct((1, 128 * num_cores), jnp.float32)
    out_h, out_w = pl.pallas_call(
        kernel,
        out_shape=(out_row, out_row),
        grid_spec=pltpu.PrefetchScalarGridSpec(
            num_scalar_prefetch=0,
            grid=(num_cores, bpc),
            in_specs=[
                pl.BlockSpec((blk, hw), x_map),
                pl.BlockSpec((1, hw), lambda c_, i: (0, 0)),   # mask_h, resident
                pl.BlockSpec((1, hw), lambda c_, i: (0, 0)),   # mask_w, resident
            ],
            out_specs=[
                pl.BlockSpec((1, 128), lambda c_, i: (0, c_)),
                pl.BlockSpec((1, 128), lambda c_, i: (0, c_)),
            ],
            scratch_shapes=[pltpu.VMEM((1, 1), jnp.float32),
                            pltpu.VMEM((1, 1), jnp.float32)],
        ),
        compiler_params=pltpu.CompilerParams(
            dimension_semantics=("parallel", "arbitrary"),
            vmem_limit_bytes=40 * 1024 * 1024,
        ),
        cost_estimate=pl.CostEstimate(
            flops=8 * nc * hw,
            transcendentals=0,
            bytes_accessed=nc * hw * itemsize + 2 * hw * 4
                           + 2 * 128 * num_cores * 4,
        ),
    )(x2, mask_h, mask_w)

    h_tv = jnp.sum(out_h.reshape(num_cores, 128)[:, 0])
    w_tv = jnp.sum(out_w.reshape(num_cores, 128)[:, 0])
    # Sum-then-divide matches the reference; count==0 -> 0/0 -> NaN like torch.
    return (h_tv / count_h + w_tv / count_w) / n


def tv_loss_ref(x):
    """Pure-JAX reference (mirrors the PyTorch module)."""
    n, c, h, w = x.shape
    count_h = c * (h - 1) * w
    count_w = c * h * (w - 1)
    h_tv = jnp.sum((x[:, :, 1:, :] - x[:, :, : h - 1, :]) ** 2)
    w_tv = jnp.sum((x[:, :, :, 1:] - x[:, :, :, : w - 1]) ** 2)
    return (h_tv / count_h + w_tv / count_w) / n


if __name__ == "__main__":
    key = jax.random.PRNGKey(0)
    k1, k2, k3, k4 = jax.random.split(key, 4)

    # Small case matching the module's expected NCHW input.
    x = jax.random.normal(k1, (2, 4, 16, 16), dtype=jnp.float32)
    out = tv_loss(x)
    jax.block_until_ready(out)
    ref = tv_loss_ref(x)
    assert jnp.allclose(out, ref, rtol=1e-4, atol=1e-5), (out, ref)

    # Multi-block grid split across the (parallel, arbitrary) axes: exercises
    # init/finalize per core and the two-partial output path.
    xb = jax.random.normal(k2, (2, 16, 16, 16), dtype=jnp.float32)
    ob = tv_loss(xb, block_nc=8)
    jax.block_until_ready(ob)
    assert jnp.allclose(ob, tv_loss_ref(xb), rtol=1e-4, atol=1e-5), (ob,)

    # Ragged N*C (15 planes): tail block row-masked in-kernel, no jnp.pad copy.
    xr = jax.random.normal(k3, (3, 5, 16, 16), dtype=jnp.float32)
    orr = tv_loss(xr, block_nc=8)
    jax.block_until_ready(orr)
    assert jnp.allclose(orr, tv_loss_ref(xr), rtol=1e-4, atol=1e-5), (orr,)

    # Odd block count (3 blocks over 2 cores): overshoot block clamped + masked.
    xo = jax.random.normal(k4, (2, 12, 16, 16), dtype=jnp.float32)
    oo = tv_loss(xo, block_nc=8)
    jax.block_until_ready(oo)
    assert jnp.allclose(oo, tv_loss_ref(xo), rtol=1e-4, atol=1e-5), (oo,)

    print("KERNEL_OK")
</pallas_src>

<mosaic_0001>
module attributes {stable_mosaic.version = 11 : i64} {
  func.func @_tv_loss_kernel(%arg0: i32, %arg1: i32, %arg2: memref<8x256xf32, #tpu.memory_space<vmem>>, %arg3: memref<1x256xf32, #tpu.memory_space<vmem>>, %arg4: memref<1x256xf32, #tpu.memory_space<vmem>>, %arg5: memref<1x128xf32, #tpu.memory_space<vmem>>, %arg6: memref<1x128xf32, #tpu.memory_space<vmem>>, %arg7: memref<1x1xf32, #tpu.memory_space<vmem>>, %arg8: memref<1x1xf32, #tpu.memory_space<vmem>>) attributes {dimension_semantics = [#tpu.dimension_semantics<parallel>, #tpu.dimension_semantics<arbitrary>], iteration_bounds = array<i64: 1, 1>, scalar_prefetch = 0 : i64, scratch_operands = 2 : i64, tpu.core_type = #tpu.core_type<tc>, window_params = [{transform_indices = @transform_0, window_bounds = array<i64: 8, 256>}, {pipeline_mode = #tpu.pipeline_mode<synchronous>, transform_indices = @transform_1, window_bounds = array<i64: 1, 256>}, {pipeline_mode = #tpu.pipeline_mode<synchronous>, transform_indices = @transform_2, window_bounds = array<i64: 1, 256>}, {transform_indices = @transform_3, window_bounds = array<i64: 1, 128>}, {transform_indices = @transform_4, window_bounds = array<i64: 1, 128>}]} {
    %c0_i32 = arith.constant 0 : i32
    %0 = arith.cmpi eq, %arg1, %c0_i32 : i32
    %1 = arith.extui %0 : i1 to i32
    %c0_i32_0 = arith.constant 0 : i32
    %2 = arith.cmpi ne, %1, %c0_i32_0 : i32
    scf.if %2 {
      %cst_21 = arith.constant 0.000000e+00 : f32
      %43 = vector.broadcast %cst_21 : f32 to vector<1x1xf32>
      %c0_22 = arith.constant 0 : index
      %c0_23 = arith.constant 0 : index
      %44 = vector.load %arg7[%c0_22, %c0_23] : memref<1x1xf32, #tpu.memory_space<vmem>>, vector<1x1xf32>
      tpu.vector_store %arg7[%c0_22, %c0_23], %43 {strides = array<i32>} : memref<1x1xf32, #tpu.memory_space<vmem>>, vector<1x1xf32>,
      %cst_24 = arith.constant 0.000000e+00 : f32
      %45 = vector.broadcast %cst_24 : f32 to vector<1x1xf32>
      %c0_25 = arith.constant 0 : index
      %c0_26 = arith.constant 0 : index
      %46 = vector.load %arg8[%c0_25, %c0_26] : memref<1x1xf32, #tpu.memory_space<vmem>>, vector<1x1xf32>
      tpu.vector_store %arg8[%c0_25, %c0_26], %45 {strides = array<i32>} : memref<1x1xf32, #tpu.memory_space<vmem>>, vector<1x1xf32>,
    } else {
    }
    %c0 = arith.constant 0 : index
    %c0_1 = arith.constant 0 : index
    %3 = vector.load %arg2[%c0, %c0_1] : memref<8x256xf32, #tpu.memory_space<vmem>>, vector<8x256xf32>
    %c0_2 = arith.constant 0 : index
    %c0_3 = arith.constant 0 : index
    %4 = vector.load %arg3[%c0_2, %c0_3] : memref<1x256xf32, #tpu.memory_space<vmem>>, vector<1x256xf32>
    %cst = arith.constant 0.000000e+00 : f32
    %5 = vector.broadcast %cst : f32 to vector<1x256xf32>
    %6 = arith.cmpf one, %4, %5 : vector<1x256xf32>
    %c0_4 = arith.constant 0 : index
    %c0_5 = arith.constant 0 : index
    %7 = vector.load %arg4[%c0_4, %c0_5] : memref<1x256xf32, #tpu.memory_space<vmem>>, vector<1x256xf32>
    %cst_6 = arith.constant 0.000000e+00 : f32
    %8 = vector.broadcast %cst_6 : f32 to vector<1x256xf32>
    %9 = arith.cmpf one, %7, %8 : vector<1x256xf32>
    %c240_i32 = arith.constant 240 : i32
    %10 = tpu.dynamic_rotate %3 by %c240_i32 dim 1 : vector<8x256xf32>, i32 -> vector<8x256xf32>
    %11 = arith.subf %10, %3 : vector<8x256xf32>
    %cst_7 = arith.constant 0.000000e+00 : f32
    %12 = vector.shape_cast %6 : vector<1x256xi1> to vector<1x256xi1>
    %13 = vector.broadcast %12 : vector<1x256xi1> to vector<8x256xi1>
    %14 = vector.broadcast %cst_7 : f32 to vector<8x256xf32>
    %15 = arith.select %13, %11, %14 : vector<8x256xi1>, vector<8x256xf32>
    %c0_8 = arith.constant 0 : index
    %c0_9 = arith.constant 0 : index
    %16 = vector.load %arg7[%c0_8, %c0_9] : memref<1x1xf32, #tpu.memory_space<vmem>>, vector<1x1xf32>
    %17 = arith.mulf %15, %15 : vector<8x256xf32>
    %18 = vector.shape_cast %17 : vector<8x256xf32> to vector<1x8x256xf32>
    %cst_10 = arith.constant dense<0.000000e+00> : vector<1xf32>
    %19 = vector.multi_reduction <add>, %18, %cst_10 [1, 2] : vector<1x8x256xf32> to vector<1xf32>
    %20 = vector.shape_cast %19 : vector<1xf32> to vector<1x1x1xf32>
    %21 = vector.extract %20[0, 0, 0] : f32 from vector<1x1x1xf32>
    %22 = vector.broadcast %21 : f32 to vector<1x1xf32>
    %23 = arith.addf %16, %22 : vector<1x1xf32>
    %c0_11 = arith.constant 0 : index
    %c0_12 = arith.constant 0 : index
    %24 = vector.load %arg7[%c0_11, %c0_12] : memref<1x1xf32, #tpu.memory_space<vmem>>, vector<1x1xf32>
    tpu.vector_store %arg7[%c0_11, %c0_12], %23 {strides = array<i32>} : memref<1x1xf32, #tpu.memory_space<vmem>>, vector<1x1xf32>,
    %c255_i32 = arith.constant 255 : i32
    %25 = tpu.dynamic_rotate %3 by %c255_i32 dim 1 : vector<8x256xf32>, i32 -> vector<8x256xf32>
    %26 = arith.subf %25, %3 : vector<8x256xf32>
    %cst_13 = arith.constant 0.000000e+00 : f32
    %27 = vector.shape_cast %9 : vector<1x256xi1> to vector<1x256xi1>
    %28 = vector.broadcast %27 : vector<1x256xi1> to vector<8x256xi1>
    %29 = vector.broadcast %cst_13 : f32 to vector<8x256xf32>
    %30 = arith.select %28, %26, %29 : vector<8x256xi1>, vector<8x256xf32>
    %c0_14 = arith.constant 0 : index
    %c0_15 = arith.constant 0 : index
    %31 = vector.load %arg8[%c0_14, %c0_15] : memref<1x1xf32, #tpu.memory_space<vmem>>, vector<1x1xf32>
    %32 = arith.mulf %30, %30 : vector<8x256xf32>
    %33 = vector.shape_cast %32 : vector<8x256xf32> to vector<1x8x256xf32>
    %cst_16 = arith.constant dense<0.000000e+00> : vector<1xf32>
    %34 = vector.multi_reduction <add>, %33, %cst_16 [1, 2] : vector<1x8x256xf32> to vector<1xf32>
    %35 = vector.shape_cast %34 : vector<1xf32> to vector<1x1x1xf32>
    %36 = vector.extract %35[0, 0, 0] : f32 from vector<1x1x1xf32>
    %37 = vector.broadcast %36 : f32 to vector<1x1xf32>
    %38 = arith.addf %31, %37 : vector<1x1xf32>
    %c0_17 = arith.constant 0 : index
    %c0_18 = arith.constant 0 : index
    %39 = vector.load %arg8[%c0_17, %c0_18] : memref<1x1xf32, #tpu.memory_space<vmem>>, vector<1x1xf32>
    tpu.vector_store %arg8[%c0_17, %c0_18], %38 {strides = array<i32>} : memref<1x1xf32, #tpu.memory_space<vmem>>, vector<1x1xf32>,
    %c0_i32_19 = arith.constant 0 : i32
    %40 = arith.cmpi eq, %arg1, %c0_i32_19 : i32
    %41 = arith.extui %40 : i1 to i32
    %c0_i32_20 = arith.constant 0 : i32
    %42 = arith.cmpi ne, %41, %c0_i32_20 : i32
    scf.if %42 {
      %c0_21 = arith.constant 0 : index
      %c0_22 = arith.constant 0 : index
      %43 = vector.load %arg7[%c0_21, %c0_22] : memref<1x1xf32, #tpu.memory_space<vmem>>, vector<1x1xf32>
      %44 = vector.shape_cast %43 : vector<1x1xf32> to vector<1x1xf32>
      %45 = vector.broadcast %44 : vector<1x1xf32> to vector<1x128xf32>
      %c0_23 = arith.constant 0 : index
      %c0_24 = arith.constant 0 : index
      %46 = vector.load %arg5[%c0_23, %c0_24] : memref<1x128xf32, #tpu.memory_space<vmem>>, vector<1x128xf32>
      tpu.vector_store %arg5[%c0_23, %c0_24], %45 {strides = array<i32>} : memref<1x128xf32, #tpu.memory_space<vmem>>, vector<1x128xf32>,
      %c0_25 = arith.constant 0 : index
      %c0_26 = arith.constant 0 : index
      %47 = vector.load %arg8[%c0_25, %c0_26] : memref<1x1xf32, #tpu.memory_space<vmem>>, vector<1x1xf32>
      %48 = vector.shape_cast %47 : vector<1x1xf32> to vector<1x1xf32>
      %49 = vector.broadcast %48 : vector<1x1xf32> to vector<1x128xf32>
      %c0_27 = arith.constant 0 : index
      %c0_28 = arith.constant 0 : index
      %50 = vector.load %arg6[%c0_27, %c0_28] : memref<1x128xf32, #tpu.memory_space<vmem>>, vector<1x128xf32>
      tpu.vector_store %arg6[%c0_27, %c0_28], %49 {strides = array<i32>} : memref<1x128xf32, #tpu.memory_space<vmem>>, vector<1x128xf32>,
    } else {
    }
    return
  }
  func.func @transform_0(%arg0: i32, %arg1: i32) -> (i32, i32) {
    %c1_i32 = arith.constant 1 : i32
    %0 = arith.muli %arg0, %c1_i32 : i32
    %1 = arith.addi %0, %arg1 : i32
    %c0_i32 = arith.constant 0 : i32
    %c0_i32_0 = arith.constant 0 : i32
    return %1, %c0_i32 : i32, i32
  }
  func.func @transform_1(%arg0: i32, %arg1: i32) -> (i32, i32) {
    %c0_i32 = arith.constant 0 : i32
    %c0_i32_0 = arith.constant 0 : i32
    %c0_i32_1 = arith.constant 0 : i32
    return %c0_i32, %c0_i32_0 : i32, i32
  }
  func.func @transform_2(%arg0: i32, %arg1: i32) -> (i32, i32) {
    %c0_i32 = arith.constant 0 : i32
    %c0_i32_0 = arith.constant 0 : i32
    %c0_i32_1 = arith.constant 0 : i32
    return %c0_i32, %c0_i32_0 : i32, i32
  }
  func.func @transform_3(%arg0: i32, %arg1: i32) -> (i32, i32) {
    %c0_i32 = arith.constant 0 : i32
    %c0_i32_0 = arith.constant 0 : i32
    return %c0_i32, %arg0 : i32, i32
  }
  func.func @transform_4(%arg0: i32, %arg1: i32) -> (i32, i32) {
    %c0_i32 = arith.constant 0 : i32
    %c0_i32_0 = arith.constant 0 : i32
    return %c0_i32, %arg0 : i32, i32
  }
}

</mosaic_0001>

<bundles_post_ra>
// kernel: tpu_custom_call.1
= control target key start
LH: loop header
LB: loop body
LE: loop exit
PB: predicated region body
PF: predicated region fallthrough
CT: control target
= control target key end

     0   :  { %10 = vsyncpa [#allocation5], 0  ;;  %s393_s0 = inlined_call_operand.hbm [shape: f32[8,256], index: 0, kind: input, shape index: {}]   ;;  %s394_s1 = inlined_call_operand.hbm [shape: f32[1,256], index: 1, kind: input, shape index: {}]   ;;  %s395_s2 = inlined_call_operand.hbm [shape: f32[1,256], index: 2, kind: input, shape index: {}]   ;;  %s396_s3 = inlined_call_operand.hbm [shape: f32[1,128], index: 3, kind: output, shape index: {0}]   ;;  %s397_s4 = inlined_call_operand.hbm [shape: f32[1,128], index: 4, kind: output, shape index: {1}]  }
   0x1   :  { %11 = vsyncpa [#allocation8], 0 }
   0x2   :  { %12 = vsyncpa [#allocation6], 0  ;;  %s34_s17 = sshll.u32 %s394_s1, 4  ;;  %s35_s17 = int_to_ptr.hbm [resolvable:$true] %s34_s17 }
   0x3   :  { %13 = vsyncpa [#allocation12], 0  ;;  %s340_s18 = smov [#allocation7]   ;;  %s23_s22 = sshll.u32 %s393_s0, 4  ;;  %s24_s22 = int_to_ptr.hbm [resolvable:$true] %s23_s22 }
   0x4   :  { %s36_s19 = sshll.u32 %s340_s18, 4  ;;  %s341_s23 = smov [#allocation4]   ;;  %s37_s19 = int_to_ptr.vmem [resolvable:$true] %s36_s19 }
   0x5   :  { %39 = dma.hbm_to_vmem [thread:$0]  %s35_s17, 32, %s37_s19, [#allocation8]  }
   0x6   :  { %s25_s24 = sshll.u32 %s341_s23, 4  ;;  %s45_s27 = sshll.u32 %s395_s2, 4  ;;  %s26_s24 = int_to_ptr.vmem [resolvable:$true] %s25_s24  ;;  %s46_s27 = int_to_ptr.hbm [resolvable:$true] %s45_s27 }
   0x7   :  { %28 = dma.hbm_to_vmem [thread:$0]  %s24_s22, 256, %s26_s24, [#allocation5]  }
   0x8   :  { %s342_s1 = smov [#allocation9]  }
   0x9   :  { %s47_s28 = sshll.u32 %s342_s1, 4  ;;  %s48_s28 = int_to_ptr.vmem [resolvable:$true] %s47_s28 }
   0xa   :  { %50 = dma.hbm_to_vmem [thread:$0]  %s46_s27, 32, %s48_s28, [#allocation8]  }
   0xb   :  { %332 = dma.done.wait [#allocation5], 256  }
   0xc   :  { %333 = vsyncadd [#allocation5], 4294967040 }
   0xd   :  { %334 = dma.done.wait [#allocation8], 64  }
   0xe   :  { %335 = vsyncadd [#allocation8], 4294967232  ;;  %v71_v0 = vld [vmem:[#allocation4] sm:$0xff]  ;;  %s343_s0 = smov 127   ;;  %s344_s29 = smov 112   ;;  %v72_v1 = vld [vmem:[#allocation4 + $0x8] sm:$0xff]  ;;  %v81_v4 = vlaneseq }
   0xf   :  { %112 = vrot.lane.b32.xlu1 %v71_v0, %s343_s0  ;;  %77 = vrot.lane.b32.xlu0 %v71_v0, %s344_s29  ;;  %v345_v2 = vmov 0   ;;  %v73_v3 = vld [vmem:[#allocation7] sm:$0x3]  ;;  %v75_v5 = vld [vmem:[#allocation9] sm:$0x3]  ;;  %vm68_vm8 = vcmask 0  }
  0x10   :  { %210 = vset.pattern.permute.xlu0 %v345_v2  ;;  %211 = vset.pattern.permute.xlu1 %v345_v2  ;;  %vm74_vm0 = vcmp.ne.f32.partialorder %v73_v3, 0.0  ;;  %v82_v9 = vand.u32 127, %v81_v4  ;;  %vm76_vm1 = vcmp.ne.f32.partialorder %v75_v5, 0.0  ;;  %v346_v35 = vmov 0.0   ;;  %s347_s5 = smov [#allocation10]   ;;  %s170_s9 = sshll.u32 %s396_s3, 4  ;;  %s171_s9 = int_to_ptr.hbm [resolvable:$true] %s170_s9 }
  0x11   :  { %v88_v8 = vsel %vm74_vm0, 1, %v345_v2  ;;  %v121_v12 = vsel %vm76_vm1, 1, %v345_v2  ;;  %69 = vst.msk [vmem:[#allocation2] sm:$0x1] %vm68_vm8, %v346_v35  ;;  %s168_s6 = sshll.u32 %s347_s5, 4  ;;  %s348_s10 = smov [#allocation11]   ;;  %s169_s6 = int_to_ptr.vmem [resolvable:$true] %s168_s6 }
  0x12   :  { %v89_v10 = vperm.slane %v88_v8, 0  ;;  %v90_v11 = vperm.slane %v88_v8, 1  ;;  %vm116_vm2 = vcmp.lt.s32.totalorder %v82_v9, 127  ;;  %vm83_vm3 = vcmp.lt.s32.totalorder %v82_v9, 112  ;;  %70 = vst.msk [vmem:[#allocation3] sm:$0x1] %vm68_vm8, %v346_v35 }
  0x13   :  { %v122_v15 = vperm.slane %v121_v12, 0  ;;  %v123_v16 = vperm.slane %v121_v12, 1  ;;  %s179_s11 = sshll.u32 %s348_s10, 4  ;;  %s181_s14 = sshll.u32 %s397_s4, 4  ;;  %s180_s11 = int_to_ptr.vmem [resolvable:$true] %s179_s11  ;;  %s182_s14 = int_to_ptr.hbm [resolvable:$true] %s181_s14 }
  0x14   :  { %vm91_vm4 = vcmp.eq.s32.totalorder %v89_v10, 1  ;;  %vm92_vm5 = vcmp.eq.s32.totalorder %v90_v11, 1 }
  0x15   :  { %vm124_vm6 = vcmp.eq.s32.totalorder %v122_v15, 1  ;;  %vm125_vm7 = vcmp.eq.s32.totalorder %v123_v16, 1 }
  0x17   :  { %114 = vrot.lane.b32.xlu1 %v72_v1, %s343_s0  ;;  %79 = vrot.lane.b32.xlu0 %v72_v1, %s344_s29 }
  0x18   :  { %v95_v50 = vld [vmem:[#allocation2] sm:$0x1] }
  0x19   :  { %v128_v53 = vld [vmem:[#allocation3] sm:$0x1] }
  0x81   :  { %v113_v6 = vpop.permute.xlu1 %112  ;;  %v78_v7 = vpop.permute.xlu0 %77 }
  0x89   :  { %v115_v13 = vpop.permute.xlu1 %114  ;;  %v80_v14 = vpop.permute.xlu0 %79 }
  0x8a   :  { %v117_v17 = vsel %vm116_vm2, %v113_v6, %v115_v13  ;;  %v118_v18 = vsel %vm116_vm2, %v115_v13, %v113_v6  ;;  %v84_v19 = vsel %vm83_vm3, %v78_v7, %v80_v14  ;;  %v85_v20 = vsel %vm83_vm3, %v80_v14, %v78_v7 }
  0x8b   :  { %v86_v21 = vsub.f32 %v84_v19, %v71_v0  ;;  %v87_v22 = vsub.f32 %v85_v20, %v72_v1  ;;  %v119_v23 = vsub.f32 %v117_v17, %v71_v0  ;;  %v120_v24 = vsub.f32 %v118_v18, %v72_v1 }
  0x8d   :  { %v93_v25 = vsel %vm91_vm4, %v86_v21, 0.0  ;;  %v94_v26 = vsel %vm92_vm5, %v87_v22, 0.0  ;;  %v126_v30 = vsel %vm124_vm6, %v119_v23, 0.0  ;;  %v127_v31 = vsel %vm125_vm7, %v120_v24, 0.0 }
  0x8e   :  { %v96_v27 = vmul.f32 %v93_v25, %v93_v25  ;;  %v97_v28 = vmul.f32 %v94_v26, %v94_v26  ;;  %v129_v32 = vmul.f32 %v126_v30, %v126_v30  ;;  %v130_v33 = vmul.f32 %v127_v31, %v127_v31 }
  0x90   :  { %v98_v29 = vadd.f32 %v97_v28, %v96_v27  ;;  %v131_v34 = vadd.f32 %v130_v33, %v129_v32 }
  0x92   :  { %99 = vadd.xlane.f32.xlu2 %v98_v29 }
  0x9a   :  { %132 = vadd.xlane.f32.xlu2 %v131_v34 }
 0x105   :  { %v100_v36 = vpop.xlane.xlu2 %99 }
 0x106   :  { %v101_v37 = vrot.slane %v100_v36, 4 }
 0x108   :  { %v102_v38 = vadd.f32 %v101_v37, %v100_v36 }
 0x10a   :  { %v103_v39 = vrot.slane %v102_v38, 2 }
 0x10c   :  { %v104_v40 = vadd.f32 %v103_v39, %v102_v38 }
 0x10d   :  { %v133_v41 = vpop.xlane.xlu2 %132 }
 0x10e   :  { %v134_v42 = vrot.slane %v133_v41, 4  ;;  %v105_v43 = vrot.slane %v104_v40, 1 }
 0x110   :  { %v135_v44 = vadd.f32 %v134_v42, %v133_v41  ;;  %v106_v45 = vadd.f32 %v105_v43, %v104_v40 }
 0x112   :  { %v136_v46 = vrot.slane %v135_v44, 2  ;;  %197 = vpush %v106_v45 }
 0x114   :  { %v137_v47 = vadd.f32 %v136_v46, %v135_v44 }
 0x116   :  { %v138_v48 = vrot.slane %v137_v47, 1 }
 0x118   :  { %v139_v49 = vadd.f32 %v138_v48, %v137_v47 }
 0x11a   :  { %199 = vpush %v139_v49 }
 0x143   :  { %s198_s2 = spop %197 }
 0x144   :  { %v108_v51 = vstv %s198_s2 }
 0x145   :  { %v109_v52 = vadd.f32 %v108_v51, %v95_v50 }
 0x147   :  { %111 = vst.msk [vmem:[#allocation2] sm:$0x1] %vm68_vm8, %v109_v52 }
 0x14b   :  { %s200_s30 = spop %199 }
 0x14c   :  { %v141_v54 = vstv %s200_s30 }
 0x14d   :  { %v142_v55 = vadd.f32 %v141_v54, %v128_v53 }
 0x14e   :  { %v147_v56 = vld [vmem:[#allocation2] sm:$0x1] }
 0x14f   :  { %143 = vst.msk [vmem:[#allocation3] sm:$0x1] %vm68_vm8, %v142_v55  ;;  %150 = vperm.xlu0 %210, %v147_v56  }
 0x156   :  { %v155_v57 = vld [vmem:[#allocation3] sm:$0x1] }
 0x157   :  { %158 = vperm.xlu1 %211, %v155_v57  }
 0x1c1   :  { %v151_v58 = vpop.permute.xlu0 %150 }
 0x1c2   :  { %v153_v59 = vperm.slane %v151_v58, 0 }
 0x1c4   :  { %154 = vst [vmem:[#allocation10] sm:$0x1] %v153_v59 }
 0x1c5   :  { %173 = dma.vmem_to_hbm [thread:$0]  %s169_s6, 16, %s171_s9, [#allocation6]  }
 0x1c9   :  { %v159_v60 = vpop.permute.xlu1 %158 }
 0x1ca   :  { %v161_v61 = vperm.slane %v159_v60, 0 }
 0x1cc   :  { %162 = vst [vmem:[#allocation11] sm:$0x1] %v161_v61 }
 0x1cd   :  { %184 = dma.vmem_to_hbm [thread:$0]  %s180_s11, 16, %s182_s14, [#allocation12]  }
 0x1ce   :  { %336 = dma.done.wait [#allocation6], 16  }
 0x1cf   :  { %337 = vsyncadd [#allocation6], 4294967280 }
 0x1d0   :  { %338 = dma.done.wait [#allocation12], 16  }
 0x1d1   :  { %339 = vsyncadd [#allocation12], 4294967280 }
 0x1d2   :  { %193 = vsyncpa [#allocation5], 1 }
 0x1d3   :  { %194 = vsyncpa [#allocation8], 1 }
 0x1d4   :  { %195 = vsyncpa [#allocation6], 1 }
 0x1d5   :  { %196 = vsyncpa [#allocation12], 1 }

</bundles_post_ra>
